<compile_context>
chip_gen: v6e
topology: v6e:2x2x1
jax: 0.10.0
libtpu: 0.0.40
codegen_flags: <defaults>
</compile_context>

<pallas_src>
import functools

import jax
import jax.numpy as jnp
from jax.experimental import pallas as pl
from jax.experimental.pallas import tpu as pltpu


def _round_up(x: int, m: int) -> int:
    return ((x + m - 1) // m) * m


def _vmem_budget_bytes() -> int:
    """Generation-aware VMEM budget (physical capacity minus ~16 MiB headroom)."""
    try:
        cap = int(pltpu.get_tpu_info().vmem_capacity_bytes)
    except Exception:
        cap = 64 << 20  # conservative fallback (v7x per-TC capacity)
    return max(cap - (16 << 20), 32 << 20)


def _mxu_align() -> int:
    """Feature-dim alignment: 256 on 256-wide MXUs (v6e/v7x) when reported, else 128."""
    try:
        info = pltpu.get_tpu_info()
        for attr in ("mxu_contracting_size", "mxu_column_size", "mxu_size"):
            v = getattr(info, attr, None)
            if isinstance(v, int) and v in (128, 256):
                return v
    except Exception:
        pass
    return 128  # always valid; only costs MXU occupancy on 256-wide chips


_BUFFERED_WEIGHTS_OK = None


def _buffered_weights_supported() -> bool:
    """One-time probe: can constant-index blocks be single-buffered via pl.Buffered(1)?"""
    global _BUFFERED_WEIGHTS_OK
    if _BUFFERED_WEIGHTS_OK is None:
        try:
            def _k(a_ref, w_ref, o_ref):
                o_ref[...] = a_ref[...] + w_ref[...]

            probe = pl.pallas_call(
                _k,
                out_shape=jax.ShapeDtypeStruct((8, 128), jnp.float32),
                grid_spec=pltpu.PrefetchScalarGridSpec(
                    num_scalar_prefetch=0,
                    grid=(2,),
                    in_specs=[
                        pl.BlockSpec((8, 128), lambda i: (0, 0)),
                        pl.BlockSpec((8, 128), lambda i: (0, 0),
                                     pipeline_mode=pl.Buffered(1)),
                    ],
                    out_specs=pl.BlockSpec((8, 128), lambda i: (0, 0)),
                ),
            )
            jax.block_until_ready(
                probe(jnp.zeros((8, 128), jnp.float32),
                      jnp.zeros((8, 128), jnp.float32)))
            _BUFFERED_WEIGHTS_OK = True
        except Exception:
            _BUFFERED_WEIGHTS_OK = False
    return _BUFFERED_WEIGHTS_OK


# --------------------------- fused (weights-resident) path ---------------------------

def _ffn_fused_kernel(x_ref,
                      w1_ref, b1_ref, w2_ref, b2_ref, w3_ref, b3_ref,
                      w4_ref, b4_ref, w5_ref, b5_ref,
                      o_ref):
    """Five chained MXU matmuls; f32 accumulation, bias+ReLU in f32, the next-layer
    operand is immediately re-packed to the compute dtype (short f32 live ranges)."""
    cdt = w1_ref.dtype

    def layer(h, w_ref, b_ref):
        acc = jnp.dot(h, w_ref[...], preferred_element_type=jnp.float32) + b_ref[...]
        return jnp.maximum(acc, 0.0).astype(cdt)  # ReLU -> dropout (identity at inference)

    h = x_ref[...]                                # already in the compute dtype (bf16)
    h = layer(h, w1_ref, b1_ref)
    h = layer(h, w2_ref, b2_ref)
    h = layer(h, w3_ref, b3_ref)
    h = layer(h, w4_ref, b4_ref)
    out = jnp.dot(h, w5_ref[...], preferred_element_type=jnp.float32) + b5_ref[...]
    o_ref[...] = out.astype(o_ref.dtype)


# --------------------------- streamed (per-layer) path -------------------------------

def _matmul_bias_kernel(x_ref, w_ref, b_ref, o_ref, acc_ref, *, relu):
    k = pl.program_id(2)

    @pl.when(k == 0)
    def _():
        acc_ref[...] = jnp.zeros_like(acc_ref)

    acc_ref[...] += jnp.dot(x_ref[...], w_ref[...], preferred_element_type=jnp.float32)

    @pl.when(k == pl.num_programs(2) - 1)
    def _():
        h = acc_ref[...] + b_ref[...]
        if relu:
            h = jnp.maximum(h, 0.0)
        o_ref[...] = h.astype(o_ref.dtype)


def _pick_tile(total: int, align: int, cap: int) -> int:
    """Largest multiple of `align` that divides `total` and is <= cap."""
    best = align
    t = align
    while t <= min(total, cap):
        if total % t == 0:
            best = t
        t += align
    return best


def _linear_layer_streamed(x2d, w, bias, *, relu, out_dtype, tm, vmem_limit):
    m_p, k_dim = x2d.shape
    n_dim = w.shape[1]
    tn = _pick_tile(n_dim, 128, 512)
    tk = _pick_tile(k_dim, 128, 512)
    kern = functools.partial(_matmul_bias_kernel, relu=relu)
    return pl.pallas_call(
        kern,
        out_shape=jax.ShapeDtypeStruct((m_p, n_dim), out_dtype),
        grid_spec=pltpu.PrefetchScalarGridSpec(
            num_scalar_prefetch=0,
            grid=(m_p // tm, n_dim // tn, k_dim // tk),
            in_specs=[
                pl.BlockSpec((tm, tk), lambda i, j, k: (i, k)),
                pl.BlockSpec((tk, tn), lambda i, j, k: (k, j)),  # weight tiles streamed from HBM
                pl.BlockSpec((1, tn), lambda i, j, k: (0, j)),
            ],
            out_specs=pl.BlockSpec((tm, tn), lambda i, j, k: (i, j)),
            scratch_shapes=[pltpu.VMEM((tm, tn), jnp.float32)],
        ),
        compiler_params=pltpu.CompilerParams(
            dimension_semantics=("parallel", "parallel", "arbitrary"),
            vmem_limit_bytes=int(vmem_limit)),
    )(x2d, w, bias)


# --------------------------- wrapper --------------------------------------------------

def prepare_ffn_params(params, *, compute_dtype=jnp.bfloat16, align=None):
    """Pad feature dims to the MXU alignment and cast weights to the compute dtype ONCE
    (hoisted out of the per-call path)."""
    if align is None:
        align = _mxu_align()
    d_model, d_ff = params["w1"].shape
    dm_p = _round_up(d_model, align)
    dff_p = _round_up(d_ff, align)

    def pw(w, rows, cols):
        return jnp.pad(w, ((0, rows - w.shape[0]), (0, cols - w.shape[1]))).astype(compute_dtype)

    def pb(bv, cols):
        return jnp.pad(bv, ((0, 0), (0, cols - bv.shape[1]))).astype(jnp.float32)

    weights = (
        pw(params["w1"], dm_p, dff_p), pb(params["b1"], dff_p),
        pw(params["w2"], dff_p, dff_p), pb(params["b2"], dff_p),
        pw(params["w3"], dff_p, dff_p), pb(params["b3"], dff_p),
        pw(params["w4"], dff_p, dff_p), pb(params["b4"], dff_p),
        pw(params["w5"], dff_p, dm_p), pb(params["b5"], dm_p),
    )
    weights = tuple(jax.block_until_ready(w) for w in weights)  # materialize once, at prep time

    _buffered_weights_supported()  # warm the one-time probe outside the hot path

    return dict(weights=weights, d_model=d_model, d_ff=d_ff,
                dm_p=dm_p, dff_p=dff_p, align=align, compute_dtype=compute_dtype)


def feed_forward_block(x, prep, *, tile_m=None, force_streamed=False):
    """x: (batch, seq, d_model). prep: output of prepare_ffn_params. Returns x.dtype output."""
    b, s, d_model = x.shape
    assert d_model == prep["d_model"], "x feature dim mismatch"
    cdt = prep["compute_dtype"]
    align = prep["align"]
    dm_p, dff_p = prep["dm_p"], prep["dff_p"]
    weights = prep["weights"]
    M = b * s

    budget = _vmem_budget_bytes()
    single_buf = _buffered_weights_supported()
    wcopies = 1 if single_buf else 2
    weight_bytes = sum(int(a.size) * a.dtype.itemsize for a in weights)
    in_isz = jnp.dtype(cdt).itemsize
    out_isz = x.dtype.itemsize

    def footprint(tm):
        tile_io = 2 * tm * dm_p * (in_isz + out_isz)  # double-buffered x / out tiles
        act = 12 * tm * dff_p                         # ~2 live f32 intermediates + bf16 repack
        return wcopies * weight_bytes + tile_io + act

    # Row tile: bigger on 128 MiB chips (amortizes ~0.35us/step), multiple of align,
    # capped so there are >= 2 grid steps when rows permit (feeds both v7x TensorCores),
    # and shrunk (never the VMEM limit) until the footprint fits the budget.
    if tile_m is None:
        tile_m = 512 if budget > (64 << 20) else 256
    m_aligned = _round_up(max(M, 1), align)
    tm = max(align, (min(tile_m, m_aligned) // align) * align)
    if m_aligned >= 2 * align:
        tm = min(tm, max(align, (m_aligned // (2 * align)) * align))
    while tm > align and footprint(tm) > budget:
        tm = max(align, ((tm // 2) // align) * align)

    use_fused = (not force_streamed) and footprint(tm) <= budget

    x2d = x.reshape(M, d_model).astype(cdt)  # ship activations in the compute dtype

    if use_fused:
        M_p = _round_up(M, tm)
        if M_p != M or dm_p != d_model:
            # TODO(synk): a masked final tile would avoid this pad copy for ragged M.
            x2d = jnp.pad(x2d, ((0, M_p - M), (0, dm_p - d_model)))

        if single_buf:
            def wspec(shape):
                return pl.BlockSpec(shape, lambda i: (0, 0), pipeline_mode=pl.Buffered(1))
        else:
            def wspec(shape):
                return pl.BlockSpec(shape, lambda i: (0, 0))

        cost = pl.CostEstimate(
            flops=2 * M_p * (2 * dm_p * dff_p + 3 * dff_p * dff_p),
            transcendentals=0,
            bytes_accessed=int(M_p * dm_p * (in_isz + out_isz) + weight_bytes),
        )

        out2d = pl.pallas_call(
            _ffn_fused_kernel,
            out_shape=jax.ShapeDtypeStruct((M_p, dm_p), x.dtype),
            grid_spec=pltpu.PrefetchScalarGridSpec(
                num_scalar_prefetch=0,
                grid=(M_p // tm,),
                in_specs=[
                    pl.BlockSpec((tm, dm_p), lambda i: (i, 0)),   # x row tile
                    wspec((dm_p, dff_p)), wspec((1, dff_p)),      # linear_1
                    wspec((dff_p, dff_p)), wspec((1, dff_p)),     # linear_2
                    wspec((dff_p, dff_p)), wspec((1, dff_p)),     # linear_3
                    wspec((dff_p, dff_p)), wspec((1, dff_p)),     # linear_4
                    wspec((dff_p, dm_p)), wspec((1, dm_p)),       # linear_5
                ],
                out_specs=pl.BlockSpec((tm, dm_p), lambda i: (i, 0)),
            ),
            compiler_params=pltpu.CompilerParams(
                dimension_semantics=("parallel",),
                vmem_limit_bytes=int(budget)),
            cost_estimate=cost,
        )(x2d, *weights)
    else:
        # Weight-streaming fallback (e.g. big d_ff under v7x's 64 MiB/TC): one tiled
        # matmul+bias(+ReLU) pallas_call per layer, weight tiles double-buffered from HBM.
        tm_s = max(128, (min(512, _round_up(M, 128)) // 128) * 128)
        M_p = _round_up(M, tm_s)
        if M_p != M or dm_p != d_model:
            x2d = jnp.pad(x2d, ((0, M_p - M), (0, dm_p - d_model)))
        w1, b1, w2, b2, w3, b3, w4, b4, w5, b5 = weights
        lay = functools.partial(_linear_layer_streamed, tm=tm_s, vmem_limit=int(budget))
        h = lay(x2d, w1, b1, relu=True, out_dtype=cdt)
        h = lay(h, w2, b2, relu=True, out_dtype=cdt)
        h = lay(h, w3, b3, relu=True, out_dtype=cdt)
        h = lay(h, w4, b4, relu=True, out_dtype=cdt)
        out2d = lay(h, w5, b5, relu=False, out_dtype=x.dtype)

    return out2d[:M, :d_model].reshape(b, s, d_model)


# --------------------------- init + reference -----------------------------------------

def init_params(key, d_model, d_ff):
    """Deterministic init mimicking nn.Linear's uniform(-1/sqrt(fan_in), +)."""
    dims = [(d_model, d_ff), (d_ff, d_ff), (d_ff, d_ff), (d_ff, d_ff), (d_ff, d_model)]
    params = {}
    keys = jax.random.split(key, 2 * len(dims))
    for idx, (din, dout) in enumerate(dims):
        bound = 1.0 / (din ** 0.5)
        params[f"w{idx + 1}"] = jax.random.uniform(
            keys[2 * idx], (din, dout), jnp.float32, -bound, bound)
        params[f"b{idx + 1}"] = jax.random.uniform(
            keys[2 * idx + 1], (1, dout), jnp.float32, -bound, bound)
    return params


def feed_forward_ref(x, params, compute_dtype=jnp.bfloat16):
    """Reference with the same bf16-operand / f32-accumulate math as the kernels."""
    h = x
    for i in range(1, 6):
        if i > 1:
            h = jnp.maximum(h, 0.0)
        h = jnp.dot(h.astype(compute_dtype), params[f"w{i}"].astype(compute_dtype),
                    preferred_element_type=jnp.float32) + params[f"b{i}"]
    return h


if __name__ == "__main__":
    batch, seq, d_model, d_ff = 2, 8, 32, 64

    key = jax.random.PRNGKey(0)
    kx, kp = jax.random.split(key)
    x = jax.random.normal(kx, (batch, seq, d_model), jnp.float32)
    params = init_params(kp, d_model, d_ff)

    prep = prepare_ffn_params(params)            # pad + bf16-cast weights once

    out = jax.block_until_ready(feed_forward_block(x, prep))
    ref = feed_forward_ref(x, params)
    assert out.shape == (batch, seq, d_model)
    assert jnp.allclose(out, ref, atol=2e-2, rtol=2e-2), float(jnp.max(jnp.abs(out - ref)))

    # Also exercise the weight-streaming path used when resident weights exceed VMEM (v7x).
    out_s = jax.block_until_ready(feed_forward_block(x, prep, force_streamed=True))
    assert jnp.allclose(out_s, ref, atol=2e-2, rtol=2e-2), float(jnp.max(jnp.abs(out_s - ref)))

    print("KERNEL_OK")
</pallas_src>

<mosaic_0001>
module attributes {stable_mosaic.version = 11 : i64} {
  func.func @_k(%arg0: i32, %arg1: memref<8x128xf32, #tpu.memory_space<vmem>>, %arg2: memref<8x128xf32, #tpu.memory_space<vmem>>, %arg3: memref<8x128xf32, #tpu.memory_space<vmem>>) attributes {dimension_semantics = [#tpu.dimension_semantics<arbitrary>], iteration_bounds = array<i64: 2>, scalar_prefetch = 0 : i64, scratch_operands = 0 : i64, tpu.core_type = #tpu.core_type<tc>, window_params = [{pipeline_mode = #tpu.pipeline_mode<synchronous>, transform_indices = @transform_0, window_bounds = array<i64: 8, 128>}, {pipeline_mode = #tpu.pipeline_mode<synchronous>, transform_indices = @transform_1, window_bounds = array<i64: 8, 128>}, {pipeline_mode = #tpu.pipeline_mode<synchronous>, transform_indices = @transform_2, window_bounds = array<i64: 8, 128>}]} {
    %c0 = arith.constant 0 : index
    %c0_0 = arith.constant 0 : index
    %0 = vector.load %arg1[%c0, %c0_0] : memref<8x128xf32, #tpu.memory_space<vmem>>, vector<8x128xf32>
    %c0_1 = arith.constant 0 : index
    %c0_2 = arith.constant 0 : index
    %1 = vector.load %arg2[%c0_1, %c0_2] : memref<8x128xf32, #tpu.memory_space<vmem>>, vector<8x128xf32>
    %2 = arith.addf %0, %1 : vector<8x128xf32>
    %c0_3 = arith.constant 0 : index
    %c0_4 = arith.constant 0 : index
    %3 = vector.load %arg3[%c0_3, %c0_4] : memref<8x128xf32, #tpu.memory_space<vmem>>, vector<8x128xf32>
    tpu.vector_store %arg3[%c0_3, %c0_4], %2 {strides = array<i32>} : memref<8x128xf32, #tpu.memory_space<vmem>>, vector<8x128xf32>,
    return
  }
  func.func @transform_0(%arg0: i32) -> (i32, i32) {
    %c0_i32 = arith.constant 0 : i32
    %c0_i32_0 = arith.constant 0 : i32
    %c0_i32_1 = arith.constant 0 : i32
    return %c0_i32, %c0_i32_0 : i32, i32
  }
  func.func @transform_1(%arg0: i32) -> (i32, i32) {
    %c0_i32 = arith.constant 0 : i32
    %c0_i32_0 = arith.constant 0 : i32
    %c0_i32_1 = arith.constant 0 : i32
    return %c0_i32, %c0_i32_0 : i32, i32
  }
  func.func @transform_2(%arg0: i32) -> (i32, i32) {
    %c0_i32 = arith.constant 0 : i32
    %c0_i32_0 = arith.constant 0 : i32
    %c0_i32_1 = arith.constant 0 : i32
    return %c0_i32, %c0_i32_0 : i32, i32
  }
}

module attributes {stable_mosaic.version = 11 : i64} {
  func.func @_ffn_fused_kernel(%arg0: i32, %arg1: memref<128x128xbf16, #tpu.memory_space<vmem>>, %arg2: memref<128x128xbf16, #tpu.memory_space<vmem>>, %arg3: memref<1x128xf32, #tpu.memory_space<vmem>>, %arg4: memref<128x128xbf16, #tpu.memory_space<vmem>>, %arg5: memref<1x128xf32, #tpu.memory_space<vmem>>, %arg6: memref<128x128xbf16, #tpu.memory_space<vmem>>, %arg7: memref<1x128xf32, #tpu.memory_space<vmem>>, %arg8: memref<128x128xbf16, #tpu.memory_space<vmem>>, %arg9: memref<1x128xf32, #tpu.memory_space<vmem>>, %arg10: memref<128x128xbf16, #tpu.memory_space<vmem>>, %arg11: memref<1x128xf32, #tpu.memory_space<vmem>>, %arg12: memref<128x128xf32, #tpu.memory_space<vmem>>) attributes {dimension_semantics = [#tpu.dimension_semantics<parallel>], iteration_bounds = array<i64: 1>, scalar_prefetch = 0 : i64, scratch_operands = 0 : i64, tpu.core_type = #tpu.core_type<tc>, window_params = [{transform_indices = @transform_0, window_bounds = array<i64: 128, 128>}, {pipeline_mode = #tpu.pipeline_mode<synchronous>, transform_indices = @transform_1, window_bounds = array<i64: 128, 128>}, {pipeline_mode = #tpu.pipeline_mode<synchronous>, transform_indices = @transform_2, window_bounds = array<i64: 1, 128>}, {pipeline_mode = #tpu.pipeline_mode<synchronous>, transform_indices = @transform_3, window_bounds = array<i64: 128, 128>}, {pipeline_mode = #tpu.pipeline_mode<synchronous>, transform_indices = @transform_4, window_bounds = array<i64: 1, 128>}, {pipeline_mode = #tpu.pipeline_mode<synchronous>, transform_indices = @transform_5, window_bounds = array<i64: 128, 128>}, {pipeline_mode = #tpu.pipeline_mode<synchronous>, transform_indices = @transform_6, window_bounds = array<i64: 1, 128>}, {pipeline_mode = #tpu.pipeline_mode<synchronous>, transform_indices = @transform_7, window_bounds = array<i64: 128, 128>}, {pipeline_mode = #tpu.pipeline_mode<synchronous>, transform_indices = @transform_8, window_bounds = array<i64: 1, 128>}, {pipeline_mode = #tpu.pipeline_mode<synchronous>, transform_indices = @transform_9, window_bounds = array<i64: 128, 128>}, {pipeline_mode = #tpu.pipeline_mode<synchronous>, transform_indices = @transform_10, window_bounds = array<i64: 1, 128>}, {transform_indices = @transform_11, window_bounds = array<i64: 128, 128>}]} {
    %c0 = arith.constant 0 : index
    %c0_0 = arith.constant 0 : index
    %0 = vector.load %arg1[%c0, %c0_0] : memref<128x128xbf16, #tpu.memory_space<vmem>>, vector<128x128xbf16>
    %c0_1 = arith.constant 0 : index
    %c0_2 = arith.constant 0 : index
    %1 = vector.load %arg2[%c0_1, %c0_2] : memref<128x128xbf16, #tpu.memory_space<vmem>>, vector<128x128xbf16>
    %cst = arith.constant dense<0.000000e+00> : vector<128x128xf32>
    %2 = tpu.matmul %0, %1, %cst {dimension_numbers = #tpu.dot_dimension_numbers<[1], [0], [0], [1], [0, 0, 1, 1], [], []>} : vector<128x128xbf16>, vector<128x128xbf16>, vector<128x128xf32> -> vector<128x128xf32>
    %c0_3 = arith.constant 0 : index
    %c0_4 = arith.constant 0 : index
    %3 = vector.load %arg3[%c0_3, %c0_4] : memref<1x128xf32, #tpu.memory_space<vmem>>, vector<1x128xf32>
    %4 = vector.broadcast %3 : vector<1x128xf32> to vector<128x128xf32>
    %5 = arith.addf %2, %4 : vector<128x128xf32>
    %cst_5 = arith.constant 0.000000e+00 : f32
    %6 = vector.broadcast %cst_5 : f32 to vector<128x128xf32>
    %7 = arith.maximumf %5, %6 : vector<128x128xf32>
    %8 = arith.truncf %7 : vector<128x128xf32> to vector<128x128xbf16>
    %c0_6 = arith.constant 0 : index
    %c0_7 = arith.constant 0 : index
    %9 = vector.load %arg4[%c0_6, %c0_7] : memref<128x128xbf16, #tpu.memory_space<vmem>>, vector<128x128xbf16>
    %cst_8 = arith.constant dense<0.000000e+00> : vector<128x128xf32>
    %10 = tpu.matmul %8, %9, %cst_8 {dimension_numbers = #tpu.dot_dimension_numbers<[1], [0], [0], [1], [0, 0, 1, 1], [], []>} : vector<128x128xbf16>, vector<128x128xbf16>, vector<128x128xf32> -> vector<128x128xf32>
    %c0_9 = arith.constant 0 : index
    %c0_10 = arith.constant 0 : index
    %11 = vector.load %arg5[%c0_9, %c0_10] : memref<1x128xf32, #tpu.memory_space<vmem>>, vector<1x128xf32>
    %12 = vector.broadcast %11 : vector<1x128xf32> to vector<128x128xf32>
    %13 = arith.addf %10, %12 : vector<128x128xf32>
    %cst_11 = arith.constant 0.000000e+00 : f32
    %14 = vector.broadcast %cst_11 : f32 to vector<128x128xf32>
    %15 = arith.maximumf %13, %14 : vector<128x128xf32>
    %16 = arith.truncf %15 : vector<128x128xf32> to vector<128x128xbf16>
    %c0_12 = arith.constant 0 : index
    %c0_13 = arith.constant 0 : index
    %17 = vector.load %arg6[%c0_12, %c0_13] : memref<128x128xbf16, #tpu.memory_space<vmem>>, vector<128x128xbf16>
    %cst_14 = arith.constant dense<0.000000e+00> : vector<128x128xf32>
    %18 = tpu.matmul %16, %17, %cst_14 {dimension_numbers = #tpu.dot_dimension_numbers<[1], [0], [0], [1], [0, 0, 1, 1], [], []>} : vector<128x128xbf16>, vector<128x128xbf16>, vector<128x128xf32> -> vector<128x128xf32>
    %c0_15 = arith.constant 0 : index
    %c0_16 = arith.constant 0 : index
    %19 = vector.load %arg7[%c0_15, %c0_16] : memref<1x128xf32, #tpu.memory_space<vmem>>, vector<1x128xf32>
    %20 = vector.broadcast %19 : vector<1x128xf32> to vector<128x128xf32>
    %21 = arith.addf %18, %20 : vector<128x128xf32>
    %cst_17 = arith.constant 0.000000e+00 : f32
    %22 = vector.broadcast %cst_17 : f32 to vector<128x128xf32>
    %23 = arith.maximumf %21, %22 : vector<128x128xf32>
    %24 = arith.truncf %23 : vector<128x128xf32> to vector<128x128xbf16>
    %c0_18 = arith.constant 0 : index
    %c0_19 = arith.constant 0 : index
    %25 = vector.load %arg8[%c0_18, %c0_19] : memref<128x128xbf16, #tpu.memory_space<vmem>>, vector<128x128xbf16>
    %cst_20 = arith.constant dense<0.000000e+00> : vector<128x128xf32>
    %26 = tpu.matmul %24, %25, %cst_20 {dimension_numbers = #tpu.dot_dimension_numbers<[1], [0], [0], [1], [0, 0, 1, 1], [], []>} : vector<128x128xbf16>, vector<128x128xbf16>, vector<128x128xf32> -> vector<128x128xf32>
    %c0_21 = arith.constant 0 : index
    %c0_22 = arith.constant 0 : index
    %27 = vector.load %arg9[%c0_21, %c0_22] : memref<1x128xf32, #tpu.memory_space<vmem>>, vector<1x128xf32>
    %28 = vector.broadcast %27 : vector<1x128xf32> to vector<128x128xf32>
    %29 = arith.addf %26, %28 : vector<128x128xf32>
    %cst_23 = arith.constant 0.000000e+00 : f32
    %30 = vector.broadcast %cst_23 : f32 to vector<128x128xf32>
    %31 = arith.maximumf %29, %30 : vector<128x128xf32>
    %32 = arith.truncf %31 : vector<128x128xf32> to vector<128x128xbf16>
    %c0_24 = arith.constant 0 : index
    %c0_25 = arith.constant 0 : index
    %33 = vector.load %arg10[%c0_24, %c0_25] : memref<128x128xbf16, #tpu.memory_space<vmem>>, vector<128x128xbf16>
    %cst_26 = arith.constant dense<0.000000e+00> : vector<128x128xf32>
    %34 = tpu.matmul %32, %33, %cst_26 {dimension_numbers = #tpu.dot_dimension_numbers<[1], [0], [0], [1], [0, 0, 1, 1], [], []>} : vector<128x128xbf16>, vector<128x128xbf16>, vector<128x128xf32> -> vector<128x128xf32>
    %c0_27 = arith.constant 0 : index
    %c0_28 = arith.constant 0 : index
    %35 = vector.load %arg11[%c0_27, %c0_28] : memref<1x128xf32, #tpu.memory_space<vmem>>, vector<1x128xf32>
    %36 = vector.broadcast %35 : vector<1x128xf32> to vector<128x128xf32>
    %37 = arith.addf %34, %36 : vector<128x128xf32>
    %c0_29 = arith.constant 0 : index
    %c0_30 = arith.constant 0 : index
    %38 = vector.load %arg12[%c0_29, %c0_30] : memref<128x128xf32, #tpu.memory_space<vmem>>, vector<128x128xf32>
    tpu.vector_store %arg12[%c0_29, %c0_30], %37 {strides = array<i32>} : memref<128x128xf32, #tpu.memory_space<vmem>>, vector<128x128xf32>,
    return
  }
  func.func @transform_0(%arg0: i32) -> (i32, i32) {
    %c0_i32 = arith.constant 0 : i32
    %c0_i32_0 = arith.constant 0 : i32
    return %arg0, %c0_i32 : i32, i32
  }
  func.func @transform_1(%arg0: i32) -> (i32, i32) {
    %c0_i32 = arith.constant 0 : i32
    %c0_i32_0 = arith.constant 0 : i32
    %c0_i32_1 = arith.constant 0 : i32
    return %c0_i32, %c0_i32_0 : i32, i32
  }
  func.func @transform_2(%arg0: i32) -> (i32, i32) {
    %c0_i32 = arith.constant 0 : i32
    %c0_i32_0 = arith.constant 0 : i32
    %c0_i32_1 = arith.constant 0 : i32
    return %c0_i32, %c0_i32_0 : i32, i32
  }
  func.func @transform_3(%arg0: i32) -> (i32, i32) {
    %c0_i32 = arith.constant 0 : i32
    %c0_i32_0 = arith.constant 0 : i32
    %c0_i32_1 = arith.constant 0 : i32
    return %c0_i32, %c0_i32_0 : i32, i32
  }
  func.func @transform_4(%arg0: i32) -> (i32, i32) {
    %c0_i32 = arith.constant 0 : i32
    %c0_i32_0 = arith.constant 0 : i32
    %c0_i32_1 = arith.constant 0 : i32
    return %c0_i32, %c0_i32_0 : i32, i32
  }
  func.func @transform_5(%arg0: i32) -> (i32, i32) {
    %c0_i32 = arith.constant 0 : i32
    %c0_i32_0 = arith.constant 0 : i32
    %c0_i32_1 = arith.constant 0 : i32
    return %c0_i32, %c0_i32_0 : i32, i32
  }
  func.func @transform_6(%arg0: i32) -> (i32, i32) {
    %c0_i32 = arith.constant 0 : i32
    %c0_i32_0 = arith.constant 0 : i32
    %c0_i32_1 = arith.constant 0 : i32
    return %c0_i32, %c0_i32_0 : i32, i32
  }
  func.func @transform_7(%arg0: i32) -> (i32, i32) {
    %c0_i32 = arith.constant 0 : i32
    %c0_i32_0 = arith.constant 0 : i32
    %c0_i32_1 = arith.constant 0 : i32
    return %c0_i32, %c0_i32_0 : i32, i32
  }
  func.func @transform_8(%arg0: i32) -> (i32, i32) {
    %c0_i32 = arith.constant 0 : i32
    %c0_i32_0 = arith.constant 0 : i32
    %c0_i32_1 = arith.constant 0 : i32
    return %c0_i32, %c0_i32_0 : i32, i32
  }
  func.func @transform_9(%arg0: i32) -> (i32, i32) {
    %c0_i32 = arith.constant 0 : i32
    %c0_i32_0 = arith.constant 0 : i32
    %c0_i32_1 = arith.constant 0 : i32
    return %c0_i32, %c0_i32_0 : i32, i32
  }
  func.func @transform_10(%arg0: i32) -> (i32, i32) {
    %c0_i32 = arith.constant 0 : i32
    %c0_i32_0 = arith.constant 0 : i32
    %c0_i32_1 = arith.constant 0 : i32
    return %c0_i32, %c0_i32_0 : i32, i32
  }
  func.func @transform_11(%arg0: i32) -> (i32, i32) {
    %c0_i32 = arith.constant 0 : i32
    %c0_i32_0 = arith.constant 0 : i32
    return %arg0, %c0_i32 : i32, i32
  }
}

</mosaic_0001>

<bundles_post_ra>
// kernel: tpu_custom_call.1
= control target key start
LH: loop header
LB: loop body
LE: loop exit
PB: predicated region body
PF: predicated region fallthrough
CT: control target
= control target key end

     0   :  { %7 = vsyncpa [#allocation3], 0  ;;  %s431_s0 = inlined_call_operand.hbm [shape: f32[8,128], index: 0, kind: input, shape index: {}]   ;;  %s432_s1 = inlined_call_operand.hbm [shape: f32[8,128], index: 1, kind: input, shape index: {}]   ;;  %s433_s2 = inlined_call_operand.hbm [shape: f32[8,128], index: 2, kind: output, shape index: {}]  }
   0x1   :  { %8 = vsyncpa [#allocation6], 0 }
   0x2   :  { %9 = vsyncpa [#allocation4], 0  ;;  %s357_s9 = smov 0  }
   0x3 LB: > { %s196_s10 = sadd.s32 4294967295, %s337_s9   ;;  %p197_p0 = scmp.ge.s32.totalorder %s337_s9, 1  ;;  %s337_s9 = sphi %s357_s9, %s15_s9  }
   0x4   : > { %p83_p1 = scmp.lt.s32.totalorder %s337_s9, 3  ;;  %p367_p2 = scmp.eq.s32.totalorder %s196_s10, 0 }
   0x5   : > { %s339_s13 = smov [#allocation2]   ;;  %s340_s15 = smov [#allocation5]  }
   0x6   : > { %s437_s11 = scalar_select %p367_p2, 1, 0 }
   0x7   : > { %p371_p3 = pnand %p197_p0, %p83_p1  ;;  %s96_s14 = sshll.u32 %s339_s13, 4  ;;  %s97_s14 = int_to_ptr.vmem [resolvable:$true] %s96_s14 }
   0x8   : > { %s107_s16 = sshll.u32 %s340_s15, 4  ;;  %s254_s18 = scalar_lea.vmem %s97_s14, 128  ;;  %s108_s16 = int_to_ptr.vmem [resolvable:$true] %s107_s16 }
   0x9   : > { %s438_s12 = scalar_select %p371_p3, 1, 0 }
   0xa   : > { %p219_p4 = pneg %p371_p3  ;;  %p255_p7 = scmp.ne.s32.totalorder %s97_s14, %s254_s18 }
   0xb   : > { %p262_p10 = scmp.lt.s32.totalorder %s97_s14, %s97_s14  ;;  %p263_p11 = scmp.lt.s32.totalorder %s254_s18, %s254_s18 }
   0xc   : > { %p379_p5 = pnand %p367_p2, %p219_p4 }
   0xd   : > { %p264_p12 = por %p263_p11, %p262_p10 }
   0xe   : > { %p245_p6 = pneg %p379_p5 }
  0x10   : > { %p257_p8 = pnand %p255_p7, %p245_p6 }
  0x12   : > { %p258_p9 = pneg %p257_p8 }
  0x14   : > { %p265_p13 = pnand %p264_p12, %p258_p9 }
  0x16   : > { %268 = shalt.err (!%p265_p13)
}
  0x17   : > { %222 = dma.hbm_to_vmem [thread:$0]  (!%p379_p5), %s431_s0, 128, %s97_s14, [#allocation3]  }
  0x18   : > { %s280_s21 = scalar_lea.vmem %s108_s16, 128  ;;  %p288_p7 = scmp.lt.s32.totalorder %s108_s16, %s108_s16 }
  0x19   : > { %p281_p0 = scmp.ne.s32.totalorder %s108_s16, %s280_s21  ;;  %p289_p8 = scmp.lt.s32.totalorder %s280_s21, %s280_s21 }
  0x1b   : > { %p283_p1 = pnand %p281_p0, %p245_p6  ;;  %p290_p2 = por %p289_p8, %p288_p7 }
  0x1d   : > { %p284_p4 = pneg %p283_p1 }
  0x1f   : > { %p291_p3 = pnand %p290_p2, %p284_p4 }
  0x21   : > { %294 = shalt.err (!%p291_p3)
}
  0x22   : > { %225 = dma.hbm_to_vmem [thread:$0]  (!%p379_p5), %s432_s1, 128, %s108_s16, [#allocation6]  }
  0x23   : > { %p440_p9 = scmp.ne.s32.totalorder %s438_s12, 0 }
  0x24   : > { %p441_p10 = scmp.ne.s32.totalorder (!%p440_p9), %s437_s11, 0 }
  0x25   : > { %120 = sbr.rel (%p440_p9) target bundleno = 60 (0x3c), region = 28 }
  0x2a   : > { %324 = dma.done.wait (%p441_p10), [#allocation3], 128  }
  0x2b   : > { %326 = vsyncadd (%p441_p10), [#allocation3], 4294967168 }
  0x2c   : > { %328 = dma.done.wait (%p441_p10), [#allocation6], 128  }
  0x2d   : > { %330 = vsyncadd (%p441_p10), [#allocation6], 4294967168  ;;  %s341_s24 = smov [#allocation7]   ;;  %v136_v0 = vld [vmem:[#allocation2] sm:$0xff]  ;;  %v137_v1 = vld [vmem:[#allocation5] sm:$0xff]  ;;  %p413_p2 = scmp.eq.s32.totalorder %s196_s10, 1 }
  0x2e   : > { %s147_s25 = sshll.u32 %s341_s24, 4  ;;  %v138_v2 = vadd.f32 %v137_v1, %v136_v0  ;;  %s148_s25 = int_to_ptr.vmem [resolvable:$true] %s147_s25 }
  0x2f   : > { %s295_s27 = scalar_lea.vmem %s148_s25, 128  ;;  %p302_p11 = scmp.lt.s32.totalorder %s148_s25, %s148_s25 }
  0x30   : > { %139 = vst [vmem:[#allocation7] sm:$0xff] %v138_v2  ;;  %p296_p3 = scmp.ne.s32.totalorder %s148_s25, %s295_s27  ;;  %p303_p12 = scmp.lt.s32.totalorder %s295_s27, %s295_s27 }
  0x32   : > { %p297_p5 = pnand %p296_p3, %p413_p2  ;;  %p304_p13 = por %p303_p12, %p302_p11 }
  0x34   : > { %p298_p6 = pneg %p297_p5 }
  0x36   : > { %p305_p0 = pnand %p304_p13, %p298_p6 }
  0x38   : > { %308 = shalt.err (!%p305_p0)
}
  0x39   : > { %216 = dma.vmem_to_hbm [thread:$0]  (%p413_p2), %s148_s25, 128, %s433_s2, [#allocation4]  }
  0x3a   : > { %332 = dma.done.wait (%p413_p2), [#allocation4], 128  }
  0x3b   : > { %334 = vsyncadd (%p413_p2), [#allocation4], 4294967168 }
  0x3c PF: > { %s15_s9 = sadd.s32 1, %s337_s9  }
  0x3d   : > { %p12_p1 = scmp.ge.s32.totalorder %s15_s9, 4  }
  0x3f   :  { %14 = sbr.rel (!%p12_p1) target bundleno = 3 (0x3), region = 61 }
  0x44   :  { %160 = vsyncpa [#allocation3], 1 }
  0x45   :  { %162 = vsyncpa [#allocation3 + $0x1], 1 }
  0x46   :  { %163 = vsyncpa [#allocation6], 1 }
  0x47   :  { %164 = vsyncpa [#allocation4], 1 }
  0x48   :  { %166 = vsyncpa [#allocation4 + $0x1], 1 }

// kernel: tpu_custom_call.1
= control target key start
LH: loop header
LB: loop body
LE: loop exit
PB: predicated region body
PF: predicated region fallthrough
CT: control target
= control target key end

     0   :  { %16 = vsyncpa [#allocation3], 0  ;;  %s1807_s0 = inlined_call_operand.hbm [shape: bf16[128,128], index: 0, kind: input, shape index: {}]   ;;  %s1808_s1 = inlined_call_operand.hbm [shape: bf16[128,128], index: 1, kind: input, shape index: {}]   ;;  %s1809_s2 = inlined_call_operand.vmem [shape: f32[1,128], index: 2, kind: input, shape index: {}]   ;;  %s1810_s3 = inlined_call_operand.hbm [shape: bf16[128,128], index: 3, kind: input, shape index: {}]   ;;  %s1811_s4 = inlined_call_operand.vmem [shape: f32[1,128], index: 4, kind: input, shape index: {}]   ;;  %s1812_s5 = inlined_call_operand.hbm [shape: bf16[128,128], index: 5, kind: input, shape index: {}]   ;;  %s1813_s6 = inlined_call_operand.vmem [shape: f32[1,128], index: 6, kind: input, shape index: {}]   ;;  %s1814_s7 = inlined_call_operand.hbm [shape: bf16[128,128], index: 7, kind: input, shape index: {}]   ;;  %s1815_s8 = inlined_call_operand.vmem [shape: f32[1,128], index: 8, kind: input, shape index: {}]   ;;  %s1816_s9 = inlined_call_operand.hbm [shape: bf16[128,128], index: 9, kind: input, shape index: {}]   ;;  %s1817_s10 = inlined_call_operand.vmem [shape: f32[1,128], index: 10, kind: input, shape index: {}]   ;;  %s1818_s11 = inlined_call_operand.hbm [shape: f32[128,128], index: 11, kind: output, shape index: {}]  }
   0x1   :  { %17 = vsyncpa [#allocation6], 0 }
   0x2   :  { %18 = vsyncpa [#allocation9], 0 }
   0x3   :  { %19 = vsyncpa [#allocation12], 0 }
   0x4   :  { %20 = vsyncpa [#allocation4], 0  ;;  %s1676_s17 = smov [#allocation5]   ;;  %s1677_s19 = smov [#allocation8]  }
   0x5   :  { %s38_s18 = sshll.u32 %s1676_s17, 4  ;;  %s66_s20 = sshll.u32 %s1677_s19, 4  ;;  %s39_s18 = int_to_ptr.vmem [resolvable:$true] %s38_s18  ;;  %s67_s20 = int_to_ptr.vmem [resolvable:$true] %s66_s20 }
   0x6   :  { %s1534_s21 = scalar_lea.vmem %s39_s18, 1024  ;;  %p1539_p1 = scmp.lt.s32.totalorder %s39_s18, %s39_s18 }
   0x7   :  { %p1535_p0 = scmp.ne.s32.totalorder %s39_s18, %s1534_s21  ;;  %p1540_p2 = scmp.lt.s32.totalorder %s1534_s21, %s1534_s21 }
   0x9   :  { %p1541_p3 = por %p1540_p2, %p1539_p1 }
   0xb   :  { %p1542_p4 = pnand %p1541_p3, %p1535_p0 }
   0xd   :  { %1545 = shalt.err (!%p1542_p4)
}
   0xe   :  { %s1678_s22 = smov 64   ;;  %s1679_s23 = smov 4  }
   0xf   :  { %44 = dma.hbm_to_vmem [thread:$0]  %s1808_s1, 1024, %s39_s18, [#allocation6], %s1678_s22, %s1678_s22, %s1679_s23  }
  0x10   :  { %s1554_s26 = scalar_lea.vmem %s67_s20, 1024  ;;  %p1559_p6 = scmp.lt.s32.totalorder %s67_s20, %s67_s20 }
  0x11   :  { %p1555_p5 = scmp.ne.s32.totalorder %s67_s20, %s1554_s26  ;;  %p1560_p7 = scmp.lt.s32.totalorder %s1554_s26, %s1554_s26 }
  0x13   :  { %p1561_p8 = por %p1560_p7, %p1559_p6 }
  0x15   :  { %p1562_p9 = pnand %p1561_p8, %p1555_p5 }
  0x17   :  { %1565 = shalt.err (!%p1562_p9)
}
  0x18   :  { %72 = dma.hbm_to_vmem [thread:$0]  %s1812_s5, 1024, %s67_s20, [#allocation9], %s1678_s22, %s1678_s22, %s1679_s23  }
  0x19   :  { %s1680_s29 = smov [#allocation2]   ;;  %s1681_s12 = smov [#allocation7]  }
  0x1a   :  { %s26_s30 = sshll.u32 %s1680_s29, 4  ;;  %s52_s13 = sshll.u32 %s1681_s12, 4  ;;  %s27_s30 = int_to_ptr.vmem [resolvable:$true] %s26_s30  ;;  %s53_s13 = int_to_ptr.vmem [resolvable:$true] %s52_s13 }
  0x1b   :  { %s1574_s1 = scalar_lea.vmem %s27_s30, 1024  ;;  %p1579_p11 = scmp.lt.s32.totalorder %s27_s30, %s27_s30 }
  0x1c   :  { %p1575_p10 = scmp.ne.s32.totalorder %s27_s30, %s1574_s1  ;;  %p1580_p12 = scmp.lt.s32.totalorder %s1574_s1, %s1574_s1 }
  0x1e   :  { %p1581_p13 = por %p1580_p12, %p1579_p11 }
  0x20   :  { %p1582_p0 = pnand %p1581_p13, %p1575_p10 }
  0x22   :  { %1585 = shalt.err (!%p1582_p0)
}
  0x23   :  { %32 = dma.hbm_to_vmem [thread:$0]  %s1807_s0, 1024, %s27_s30, [#allocation3], %s1678_s22, %s1678_s22, %s1679_s23  }
  0x24   :  { %s1594_s5 = scalar_lea.vmem %s53_s13, 1024  ;;  %p1599_p2 = scmp.lt.s32.totalorder %s53_s13, %s53_s13 }
  0x25   :  { %p1595_p1 = scmp.ne.s32.totalorder %s53_s13, %s1594_s5  ;;  %p1600_p3 = scmp.lt.s32.totalorder %s1594_s5, %s1594_s5 }
  0x27   :  { %p1601_p4 = por %p1600_p3, %p1599_p2 }
  0x29   :  { %p1602_p5 = pnand %p1601_p4, %p1595_p1 }
  0x2b   :  { %1605 = shalt.err (!%p1602_p5)
}
  0x2c   :  { %58 = dma.hbm_to_vmem [thread:$0]  %s1810_s3, 1024, %s53_s13, [#allocation6], %s1678_s22, %s1678_s22, %s1679_s23  }
  0x2d   :  { %s1682_s18 = smov [#allocation10]   ;;  %s1683_s20 = smov [#allocation11]  }
  0x2e   :  { %s80_s19 = sshll.u32 %s1682_s18, 4  ;;  %s94_s21 = sshll.u32 %s1683_s20, 4  ;;  %s81_s19 = int_to_ptr.vmem [resolvable:$true] %s80_s19  ;;  %s95_s21 = int_to_ptr.vmem [resolvable:$true] %s94_s21 }
  0x2f   :  { %s1614_s0 = scalar_lea.vmem %s81_s19, 1024  ;;  %p1619_p7 = scmp.lt.s32.totalorder %s81_s19, %s81_s19 }
  0x30   :  { %p1615_p6 = scmp.ne.s32.totalorder %s81_s19, %s1614_s0  ;;  %p1620_p8 = scmp.lt.s32.totalorder %s1614_s0, %s1614_s0 }
  0x32   :  { %p1621_p9 = por %p1620_p8, %p1619_p7 }
  0x34   :  { %p1622_p10 = pnand %p1621_p9, %p1615_p6 }
  0x36   :  { %1625 = shalt.err (!%p1622_p10)
}
  0x37   :  { %86 = dma.hbm_to_vmem [thread:$0]  %s1814_s7, 1024, %s81_s19, [#allocation9], %s1678_s22, %s1678_s22, %s1679_s23  }
  0x38   :  { %s1634_s3 = scalar_lea.vmem %s95_s21, 1024  ;;  %p1639_p12 = scmp.lt.s32.totalorder %s95_s21, %s95_s21 }
  0x39   :  { %p1635_p11 = scmp.ne.s32.totalorder %s95_s21, %s1634_s3  ;;  %p1640_p13 = scmp.lt.s32.totalorder %s1634_s3, %s1634_s3 }
  0x3b   :  { %p1641_p0 = por %p1640_p13, %p1639_p12 }
  0x3d   :  { %p1642_p1 = pnand %p1641_p0, %p1635_p11 }
  0x3f   :  { %1645 = shalt.err (!%p1642_p1)
}
  0x40   :  { %100 = dma.hbm_to_vmem [thread:$0]  %s1816_s9, 1024, %s95_s21, [#allocation12], %s1678_s22, %s1678_s22, %s1679_s23  }
  0x41   :  { %1666 = dma.done.wait [#allocation3], 1024  }
  0x42   :  { %1667 = vsyncadd [#allocation3], 4294966272 }
  0x43   :  { %1668 = dma.done.wait [#allocation6], 2048  }
  0x44   :  { %1669 = vsyncadd [#allocation6], 4294965248 }
  0x45   :  { %1670 = dma.done.wait [#allocation9], 2048  }
  0x46   :  { %1671 = vsyncadd [#allocation9], 4294965248 }
  0x47   :  { %1672 = dma.done.wait [#allocation12], 1024  }
  0x48   :  { %1673 = vsyncadd [#allocation12], 4294966272  ;;  %v1478_v0 = vld [vmem:[#allocation5 + $0x38] sm:$0xff]   ;;  %v1479_v1 = vld [vmem:[#allocation5 + $0x30] sm:$0xff]  }
  0x49   :  { %1291 = vmatprep.subr.bf16.mxu0 %v1478_v0  ;;  %v1480_v2 = vld [vmem:[#allocation5 + $0x28] sm:$0xff]   ;;  %v1481_v3 = vld [vmem:[#allocation5 + $0x20] sm:$0xff]   ;;  %v1482_v5 = vld [vmem:[#allocation5 + $0x18] sm:$0xff]  }
  0x4a   :  { %1292 = vmatpush3.bf16.msra.mxu0 %v1478_v0  ;;  %v1486_v4 = vld [vmem:[#allocation2] sm:$0xff]   ;;  %v1483_v6 = vld [vmem:[#allocation5 + $0x10] sm:$0xff]   ;;  %v1494_v7 = vld [vmem:[#allocation7 + $0x38] sm:$0xff]  }
  0x4b   :  { %1293 = vmatprep.subr.bf16.mxu0 %v1479_v1  ;;  %1307 = vmatprep.mubr.bf16.mxu0 %v1486_v4  ;;  %v1495_v8 = vld [vmem:[#allocation7 + $0x30] sm:$0xff]   ;;  %v1484_v9 = vld [vmem:[#allocation5 + $0x8] sm:$0xff]   ;;  %v1485_v11 = vld [vmem:[#allocation5] sm:$0xff]  }
  0x4c   :  { %1323 = vmatprep.subr.bf16.mxu1 %v1494_v7  ;;  %v1496_v10 = vld [vmem:[#allocation7 + $0x28] sm:$0xff]   ;;  %v1497_v12 = vld [vmem:[#allocation7 + $0x20] sm:$0xff]   ;;  %v1498_v13 = vld [vmem:[#allocation7 + $0x18] sm:$0xff]  }
  0x4d   :  { %1324 = vmatpush3.bf16.msra.mxu1 %v1494_v7  ;;  %v1487_v14 = vld [vmem:[#allocation2 + $0x8] sm:$0xff]   ;;  %v1488_v15 = vld [vmem:[#allocation2 + $0x10] sm:$0xff]   ;;  %v1489_v16 = vld [vmem:[#allocation2 + $0x18] sm:$0xff]  }
  0x4e   :  { %1294 = vmatpush3.bf16.msra.mxu0 %v1479_v1  ;;  %1325 = vmatprep.subr.bf16.mxu1 %v1495_v8  ;;  %v1490_v17 = vld [vmem:[#allocation2 + $0x20] sm:$0xff]   ;;  %v1491_v18 = vld [vmem:[#allocation2 + $0x28] sm:$0xff]   ;;  %v1492_v19 = vld [vmem:[#allocation2 + $0x30] sm:$0xff]  }
  0x4f   :  { %1295 = vmatprep.subr.bf16.mxu0 %v1480_v2  ;;  %v1493_v20 = vld [vmem:[#allocation2 + $0x38] sm:$0xff]   ;;  %v1499_v21 = vld [vmem:[#allocation7 + $0x10] sm:$0xff]   ;;  %v1500_v22 = vld [vmem:[#allocation7 + $0x8] sm:$0xff]  }
  0x50   :  { %v1501_v23 = vld [vmem:[#allocation7] sm:$0xff]   ;;  %v1502_v24 = vld [vmem:[#allocation8 + $0x38] sm:$0xff]   ;;  %v1503_v25 = vld [vmem:[#allocation8 + $0x30] sm:$0xff]  }
  0x51   :  { %1326 = vmatpush3.bf16.msra.mxu1 %v1495_v8  ;;  %v1504_v26 = vld [vmem:[#allocation8 + $0x28] sm:$0xff]   ;;  %v1505_v27 = vld [vmem:[#allocation8 + $0x20] sm:$0xff]   ;;  %v1506_v28 = vld [vmem:[#allocation8 + $0x18] sm:$0xff]  }
  0x52   :  { %1296 = vmatpush3.bf16.msra.mxu0 %v1480_v2  ;;  %1327 = vmatprep.subr.bf16.mxu1 %v1496_v10  ;;  %v1158_v31 = vld [vmem:[%s1809_s2] ss:$0 sm:$0xff] }
  0x53   :  { %1297 = vmatprep.subr.bf16.mxu0 %v1481_v3 }
  0x55   :  { %1328 = vmatpush3.bf16.msra.mxu1 %v1496_v10 }
  0x56   :  { %1298 = vmatpush3.bf16.msra.mxu0 %v1481_v3  ;;  %1329 = vmatprep.subr.bf16.mxu1 %v1497_v12 }
  0x57   :  { %1299 = vmatprep.subr.bf16.mxu0 %v1482_v5 }
  0x59   :  { %1330 = vmatpush3.bf16.msra.mxu1 %v1497_v12 }
  0x5a   :  { %1300 = vmatpush3.bf16.msra.mxu0 %v1482_v5  ;;  %1331 = vmatprep.subr.bf16.mxu1 %v1498_v13 }
  0x5b   :  { %1301 = vmatprep.subr.bf16.mxu0 %v1483_v6 }
  0x5d   :  { %1332 = vmatpush3.bf16.msra.mxu1 %v1498_v13 }
  0x5e   :  { %1302 = vmatpush3.bf16.msra.mxu0 %v1483_v6  ;;  %1333 = vmatprep.subr.bf16.mxu1 %v1499_v21 }
  0x5f   :  { %1303 = vmatprep.subr.bf16.mxu0 %v1484_v9 }
  0x61   :  { %1334 = vmatpush3.bf16.msra.mxu1 %v1499_v21 }
  0x62   :  { %1304 = vmatpush3.bf16.msra.mxu0 %v1484_v9  ;;  %1335 = vmatprep.subr.bf16.mxu1 %v1500_v22 }
  0x63   :  { %1305 = vmatprep.subr.bf16.mxu0 %v1485_v11 }
  0x65   :  { %1336 = vmatpush3.bf16.msra.mxu1 %v1500_v22  ;;  %v1507_v22 = vld [vmem:[#allocation8 + $0x10] sm:$0xff]  }
  0x66   :  { %1306 = vmatpush3.bf16.msra.mxu0 %v1485_v11  ;;  %1337 = vmatprep.subr.bf16.mxu1 %v1501_v23 }
  0x67   :  { %1355 = vmatprep.subr.bf16.mxu0 %v1502_v24 }
  0x69   :  { %1308 = vmatmul.mubr.bf16.vlgmr.msra.gmra.mxu0 %v1487_v14  ;;  %1338 = vmatpush3.bf16.msra.mxu1 %v1501_v23  ;;  %v1508_v23 = vld [vmem:[#allocation8 + $0x8] sm:$0xff]  }
  0x6a   :  { %1311 = vmatprep.mubr.bf16.mxu0 %v1488_v15  ;;  %1356 = vmatpush3.bf16.msra.mxu0 %v1502_v24  ;;  %v1509_v24 = vld [vmem:[#allocation8] sm:$0xff]  }
  0x6b   :  { %1357 = vmatprep.subr.bf16.mxu0 %v1503_v25 }
  0x6e   :  { %1358 = vmatpush3.bf16.msra.mxu0 %v1503_v25  ;;  %v1510_v25 = vld [vmem:[#allocation10 + $0x38] sm:$0xff]  }
  0x6f   :  { %1359 = vmatprep.subr.bf16.mxu0 %v1504_v26  ;;  %1387 = vmatprep.subr.bf16.mxu1 %v1510_v25 }
  0x71   :  { %1312 = vmatmul.mubr.bf16.gmra.mxu0 %v1489_v16 }
  0x72   :  { %1315 = vmatprep.mubr.bf16.mxu0 %v1490_v17  ;;  %1360 = vmatpush3.bf16.msra.mxu0 %v1504_v26  ;;  %v1511_v26 = vld [vmem:[#allocation10 + $0x30] sm:$0xff]  }
  0x73   :  { %1361 = vmatprep.subr.bf16.mxu0 %v1505_v27 }
  0x76   :  { %1362 = vmatpush3.bf16.msra.mxu0 %v1505_v27  ;;  %v1512_v27 = vld [vmem:[#allocation10 + $0x28] sm:$0xff]  }
  0x77   :  { %1363 = vmatprep.subr.bf16.mxu0 %v1506_v28 }
  0x79   :  { %1316 = vmatmul.mubr.bf16.gmra.mxu0 %v1491_v18 }
  0x7a   :  { %1319 = vmatprep.mubr.bf16.mxu0 %v1492_v19  ;;  %1364 = vmatpush3.bf16.msra.mxu0 %v1506_v28  ;;  %v1513_v28 = vld [vmem:[#allocation10 + $0x20] sm:$0xff]  }
  0x7b   :  { %1365 = vmatprep.subr.bf16.mxu0 %v1507_v22 }
  0x7e   :  { %1366 = vmatpush3.bf16.msra.mxu0 %v1507_v22 }
  0x7f   :  { %1367 = vmatprep.subr.bf16.mxu0 %v1508_v23 }
  0x81   :  { %1320 = vmatmul.mubr.bf16.gmra.mxu0 %v1493_v20 }
  0x82   :  { %1368 = vmatpush3.bf16.msra.mxu0 %v1508_v23  ;;  %v1515_v23 = vld [vmem:[#allocation10 + $0x10] sm:$0xff]  }
  0x83   :  { %1369 = vmatprep.subr.bf16.mxu0 %v1509_v24 }
  0x86   :  { %1370 = vmatpush3.bf16.msra.mxu0 %v1509_v24  ;;  %v1516_v24 = vld [vmem:[#allocation10 + $0x8] sm:$0xff]  }
 0x129   :  { %v1309_v29 = vpop.f32.mrf.mxu0 }
 0x12a   :  { %v300_v35 = vadd.f32 %v1309_v29, %v1158_v31  ;;  %v1514_v29 = vld [vmem:[#allocation10 + $0x18] sm:$0xff]  }
 0x12b   :  { %v291_v30 = vpop.f32.mrf.mxu0 }
 0x12c   :  { %v292_v33 = vadd.f32 %v1158_v31, %v291_v30  ;;  %v356_v42 = vmax.f32 %v300_v35, 0.0 }
 0x12d   :  { %v1310_v32 = vpop.f32.mrf.mxu0 }
 0x12e   :  { %v303_v34 = vadd.f32 %v1310_v32, %v1158_v31  ;;  %v354_v40 = vmax.f32 %v292_v33, 0.0  ;;  %v1175_v32 = vld [vmem:[%s1811_s4] ss:$0 sm:$0xff] }
 0x12f   :  { %v294_v36 = vpop.f32.mrf.mxu0 }
 0x130   :  { %v295_v37 = vadd.f32 %v1158_v31, %v294_v36  ;;  %v357_v38 = vmax.f32 %v303_v34, 0.0 }
 0x131   :  { %v1313_v39 = vpop.f32.mrf.mxu0 }
 0x132   :  { %v355_v41 = vmax.f32 %v295_v37, 0.0  ;;  %v371_v45 = vpack.c.bf16 %v357_v38, %v356_v42  ;;  %v316_v49 = vadd.f32 %v1313_v39, %v1158_v31 }
 0x133   :  { %v307_v43 = vpop.f32.mrf.mxu0 }
 0x134   :  { %v370_v44 = vpack.c.bf16 %v355_v41, %v354_v40  ;;  %v308_v47 = vadd.f32 %v1158_v31, %v307_v43  ;;  %v360_v56 = vmax.f32 %v316_v49, 0.0 }
 0x135   :  { %v1314_v46 = vpop.f32.mrf.mxu0 }
 0x136   :  { %v319_v48 = vadd.f32 %v1314_v46, %v1158_v31  ;;  %1339 = vmatprep.mubr.bf16.mxu1 %v370_v44  ;;  %v358_v54 = vmax.f32 %v308_v47, 0.0 }
 0x137   :  { %v310_v50 = vpop.f32.mrf.mxu0  ;;  %1340 = vmatmul.mubr.bf16.vlgmr.msra.gmra.mxu1 %v371_v45 }
 0x138   :  { %v311_v51 = vadd.f32 %v1158_v31, %v310_v50  ;;  %v361_v52 = vmax.f32 %v319_v48, 0.0  ;;  %1388 = vmatpush3.bf16.msra.mxu1 %v1510_v25  ;;  %v1517_v25 = vld [vmem:[#allocation10] sm:$0xff]  }
 0x139   :  { %v1317_v53 = vpop.f32.mrf.mxu0  ;;  %1389 = vmatprep.subr.bf16.mxu1 %v1511_v26 }
 0x13a   :  { %v359_v55 = vmax.f32 %v311_v51, 0.0  ;;  %v373_v59 = vpack.c.bf16 %v361_v52, %v360_v56  ;;  %v332_v63 = vadd.f32 %v1317_v53, %v1158_v31 }
 0x13b   :  { %v323_v57 = vpop.f32.mrf.mxu0 }
 0x13c   :  { %v372_v58 = vpack.c.bf16 %v359_v55, %v358_v54  ;;  %v324_v61 = vadd.f32 %v1158_v31, %v323_v57  ;;  %v364_v6 = vmax.f32 %v332_v63, 0.0  ;;  %1390 = vmatpush3.bf16.msra.mxu1 %v1511_v26  ;;  %v1518_v26 = vld [vmem:[#allocation11 + $0x38] sm:$0xff]  }
 0x13d   :  { %v1318_v60 = vpop.f32.mrf.mxu0  ;;  %1391 = vmatprep.subr.bf16.mxu1 %v1512_v27  ;;  %1419 = vmatprep.subr.bf16.mxu0 %v1518_v26 }
 0x13e   :  { %v335_v62 = vadd.f32 %v1318_v60, %v1158_v31  ;;  %1343 = vmatprep.mubr.bf16.mxu1 %v372_v58  ;;  %v362_v4 = vmax.f32 %v324_v61, 0.0 }
 0x13f   :  { %v326_v0 = vpop.f32.mrf.mxu0  ;;  %1344 = vmatmul.mubr.bf16.gmra.mxu1 %v373_v59 }
 0x140   :  { %v327_v1 = vadd.f32 %v1158_v31, %v326_v0  ;;  %v365_v2 = vmax.f32 %v335_v62, 0.0  ;;  %1392 = vmatpush3.bf16.msra.mxu1 %v1512_v27  ;;  %v1519_v27 = vld [vmem:[#allocation11 + $0x30] sm:$0xff]  }
 0x141   :  { %v1321_v3 = vpop.f32.mrf.mxu0  ;;  %1393 = vmatprep.subr.bf16.mxu1 %v1513_v28 }
 0x142   :  { %v363_v5 = vmax.f32 %v327_v1, 0.0  ;;  %v375_v9 = vpack.c.bf16 %v365_v2, %v364_v6  ;;  %v348_v13 = vadd.f32 %v1321_v3, %v1158_v31 }
 0x143   :  { %v339_v7 = vpop.f32.mrf.mxu0 }
 0x144   :  { %v374_v8 = vpack.c.bf16 %v363_v5, %v362_v4  ;;  %v340_v11 = vadd.f32 %v1158_v31, %v339_v7  ;;  %v368_v19 = vmax.f32 %v348_v13, 0.0  ;;  %1394 = vmatpush3.bf16.msra.mxu1 %v1513_v28  ;;  %v1520_v28 = vld [vmem:[#allocation11 + $0x28] sm:$0xff]  }
 0x145   :  { %v1322_v10 = vpop.f32.mrf.mxu0  ;;  %1395 = vmatprep.subr.bf16.mxu1 %v1514_v29 }
 0x146   :  { %v351_v12 = vadd.f32 %v1322_v10, %v1158_v31  ;;  %1347 = vmatprep.mubr.bf16.mxu1 %v374_v8  ;;  %v366_v17 = vmax.f32 %v340_v11, 0.0 }
 0x147   :  { %v342_v14 = vpop.f32.mrf.mxu0  ;;  %1348 = vmatmul.mubr.bf16.gmra.mxu1 %v375_v9 }
 0x148   :  { %v343_v15 = vadd.f32 %v1158_v31, %v342_v14  ;;  %v369_v16 = vmax.f32 %v351_v12, 0.0  ;;  %1396 = vmatpush3.bf16.msra.mxu1 %v1514_v29  ;;  %v1521_v29 = vld [vmem:[#allocation11 + $0x20] sm:$0xff]  }
 0x149   :  { %1397 = vmatprep.subr.bf16.mxu1 %v1515_v23 }
 0x14a   :  { %v367_v18 = vmax.f32 %v343_v15, 0.0  ;;  %v377_v21 = vpack.c.bf16 %v369_v16, %v368_v19 }
 0x14c   :  { %v376_v20 = vpack.c.bf16 %v367_v18, %v366_v17  ;;  %1398 = vmatpush3.bf16.msra.mxu1 %v1515_v23 }
 0x14d   :  { %1399 = vmatprep.subr.bf16.mxu1 %v1516_v24 }
 0x14e   :  { %1351 = vmatprep.mubr.bf16.mxu1 %v376_v20 }
 0x14f   :  { %1352 = vmatmul.mubr.bf16.gmra.mxu1 %v377_v21 }
 0x150   :  { %1400 = vmatpush3.bf16.msra.mxu1 %v1516_v24  ;;  %v1523_v24 = vld [vmem:[#allocation11 + $0x10] sm:$0xff]  }
 0x151   :  { %1401 = vmatprep.subr.bf16.mxu1 %v1517_v25 }
 0x154   :  { %1402 = vmatpush3.bf16.msra.mxu1 %v1517_v25  ;;  %v1524_v25 = vld [vmem:[#allocation11 + $0x8] sm:$0xff]  }
 0x155   :  { %1451 = vmatprep.subr.bf16.mxu1 %v1518_v26 }
 0x1f7   :  { %v1341_v30 = vpop.f32.mrf.mxu1 }
 0x1f8   :  { %v492_v36 = vadd.f32 %v1341_v30, %v1175_v32  ;;  %v1789_v30 = vld [vmem:[#allocation11 + $0x18] sm:$0xff]  }
 0x1f9   :  { %v483_v31 = vpop.f32.mrf.mxu1 }
 0x1fa   :  { %v484_v34 = vadd.f32 %v1175_v32, %v483_v31  ;;  %v548_v43 = vmax.f32 %v492_v36, 0.0 }
 0x1fb   :  { %v1342_v33 = vpop.f32.mrf.mxu1 }
 0x1fc   :  { %v495_v35 = vadd.f32 %v1342_v33, %v1175_v32  ;;  %v546_v41 = vmax.f32 %v484_v34, 0.0  ;;  %v1184_v33 = vld [vmem:[%s1813_s6] ss:$0 sm:$0xff] }
 0x1fd   :  { %v486_v37 = vpop.f32.mrf.mxu1 }
 0x1fe   :  { %v487_v38 = vadd.f32 %v1175_v32, %v486_v37  ;;  %v549_v39 = vmax.f32 %v495_v35, 0.0 }
 0x1ff   :  { %v1345_v40 = vpop.f32.mrf.mxu1 }
 0x200   :  { %v547_v42 = vmax.f32 %v487_v38, 0.0  ;;  %v563_v46 = vpack.c.bf16 %v549_v39, %v548_v43  ;;  %v508_v50 = vadd.f32 %v1345_v40, %v1175_v32 }
 0x201   :  { %v499_v44 = vpop.f32.mrf.mxu1 }
 0x202   :  { %v562_v45 = vpack.c.bf16 %v547_v42, %v546_v41  ;;  %v500_v48 = vadd.f32 %v1175_v32, %v499_v44  ;;  %v552_v57 = vmax.f32 %v508_v50, 0.0 }
 0x203   :  { %v1346_v47 = vpop.f32.mrf.mxu1 }
 0x204   :  { %v511_v49 = vadd.f32 %v1346_v47, %v1175_v32  ;;  %1371 = vmatprep.mubr.bf16.mxu0 %v562_v45  ;;  %v550_v55 = vmax.f32 %v500_v48, 0.0 }
 0x205   :  { %v502_v51 = vpop.f32.mrf.mxu1  ;;  %1372 = vmatmul.mubr.bf16.vlgmr.msra.gmra.mxu0 %v563_v46 }
 0x206   :  { %v503_v52 = vadd.f32 %v1175_v32, %v502_v51  ;;  %v553_v53 = vmax.f32 %v511_v49, 0.0  ;;  %1420 = vmatpush3.bf16.msra.mxu0 %v1518_v26 }
 0x207   :  { %v1349_v54 = vpop.f32.mrf.mxu1  ;;  %1421 = vmatprep.subr.bf16.mxu0 %v1519_v27 }
 0x208   :  { %v551_v56 = vmax.f32 %v503_v52, 0.0  ;;  %v565_v60 = vpack.c.bf16 %v553_v53, %v552_v57  ;;  %v524_v0 = vadd.f32 %v1349_v54, %v1175_v32 }
 0x209   :  { %v515_v58 = vpop.f32.mrf.mxu1 }
 0x20a   :  { %v564_v59 = vpack.c.bf16 %v551_v56, %v550_v55  ;;  %v516_v62 = vadd.f32 %v1175_v32, %v515_v58  ;;  %v556_v7 = vmax.f32 %v524_v0, 0.0  ;;  %1422 = vmatpush3.bf16.msra.mxu0 %v1519_v27 }
 0x20b   :  { %v1350_v61 = vpop.f32.mrf.mxu1  ;;  %1423 = vmatprep.subr.bf16.mxu0 %v1520_v28 }
 0x20c   :  { %v527_v63 = vadd.f32 %v1350_v61, %v1175_v32  ;;  %1375 = vmatprep.mubr.bf16.mxu0 %v564_v59  ;;  %v554_v5 = vmax.f32 %v516_v62, 0.0 }
 0x20d   :  { %v518_v1 = vpop.f32.mrf.mxu1  ;;  %1376 = vmatmul.mubr.bf16.gmra.mxu0 %v565_v60 }
 0x20e   :  { %v519_v2 = vadd.f32 %v1175_v32, %v518_v1  ;;  %v557_v3 = vmax.f32 %v527_v63, 0.0  ;;  %1424 = vmatpush3.bf16.msra.mxu0 %v1520_v28 }
 0x20f   :  { %v1353_v4 = vpop.f32.mrf.mxu1  ;;  %1425 = vmatprep.subr.bf16.mxu0 %v1521_v29 }
 0x210   :  { %v555_v6 = vmax.f32 %v519_v2, 0.0  ;;  %v567_v10 = vpack.c.bf16 %v557_v3, %v556_v7  ;;  %v540_v14 = vadd.f32 %v1353_v4, %v1175_v32 }
 0x211   :  { %v531_v8 = vpop.f32.mrf.mxu1 }
 0x212   :  { %v566_v9 = vpack.c.bf16 %v555_v6, %v554_v5  ;;  %v532_v12 = vadd.f32 %v1175_v32, %v531_v8  ;;  %v560_v20 = vmax.f32 %v540_v14, 0.0  ;;  %1426 = vmatpush3.bf16.msra.mxu0 %v1521_v29 }
 0x213   :  { %v1354_v11 = vpop.f32.mrf.mxu1  ;;  %1427 = vmatprep.subr.bf16.mxu0 %v1789_v30 }
 0x214   :  { %v543_v13 = vadd.f32 %v1354_v11, %v1175_v32  ;;  %1379 = vmatprep.mubr.bf16.mxu0 %v566_v9  ;;  %v558_v18 = vmax.f32 %v532_v12, 0.0 }
 0x215   :  { %v534_v15 = vpop.f32.mrf.mxu1  ;;  %1380 = vmatmul.mubr.bf16.gmra.mxu0 %v567_v10 }
 0x216   :  { %v535_v16 = vadd.f32 %v1175_v32, %v534_v15  ;;  %v561_v17 = vmax.f32 %v543_v13, 0.0  ;;  %1428 = vmatpush3.bf16.msra.mxu0 %v1789_v30 }
 0x217   :  { %1429 = vmatprep.subr.bf16.mxu0 %v1523_v24 }
 0x218   :  { %v559_v19 = vmax.f32 %v535_v16, 0.0  ;;  %v569_v22 = vpack.c.bf16 %v561_v17, %v560_v20 }
 0x21a   :  { %v568_v21 = vpack.c.bf16 %v559_v19, %v558_v18  ;;  %1430 = vmatpush3.bf16.msra.mxu0 %v1523_v24 }
 0x21b   :  { %1431 = vmatprep.subr.bf16.mxu0 %v1524_v25 }
 0x21c   :  { %1383 = vmatprep.mubr.bf16.mxu0 %v568_v21 }
 0x21d   :  { %1384 = vmatmul.mubr.bf16.gmra.mxu0 %v569_v22 }
 0x21e   :  { %1432 = vmatpush3.bf16.msra.mxu0 %v1524_v25 }
 0x2c5   :  { %v1373_v31 = vpop.f32.mrf.mxu0 }
 0x2c6   :  { %v684_v37 = vadd.f32 %v1373_v31, %v1184_v33 }
 0x2c7   :  { %v675_v32 = vpop.f32.mrf.mxu0 }
 0x2c8   :  { %v676_v35 = vadd.f32 %v1184_v33, %v675_v32  ;;  %v740_v44 = vmax.f32 %v684_v37, 0.0 }
 0x2c9   :  { %v1374_v34 = vpop.f32.mrf.mxu0 }
 0x2ca   :  { %v687_v36 = vadd.f32 %v1374_v34, %v1184_v33  ;;  %v738_v42 = vmax.f32 %v676_v35, 0.0 }
 0x2cb   :  { %v678_v38 = vpop.f32.mrf.mxu0 }
 0x2cc   :  { %v679_v39 = vadd.f32 %v1184_v33, %v678_v38  ;;  %v741_v40 = vmax.f32 %v687_v36, 0.0 }
 0x2cd   :  { %v1377_v41 = vpop.f32.mrf.mxu0 }
 0x2ce   :  { %v739_v43 = vmax.f32 %v679_v39, 0.0  ;;  %v755_v47 = vpack.c.bf16 %v741_v40, %v740_v44  ;;  %v700_v51 = vadd.f32 %v1377_v41, %v1184_v33 }
 0x2cf   :  { %v691_v45 = vpop.f32.mrf.mxu0 }
 0x2d0   :  { %v754_v46 = vpack.c.bf16 %v739_v43, %v738_v42  ;;  %v692_v49 = vadd.f32 %v1184_v33, %v691_v45  ;;  %v744_v58 = vmax.f32 %v700_v51, 0.0 }
 0x2d1   :  { %v1378_v48 = vpop.f32.mrf.mxu0 }
 0x2d2   :  { %v703_v50 = vadd.f32 %v1378_v48, %v1184_v33  ;;  %1403 = vmatprep.mubr.bf16.mxu1 %v754_v46  ;;  %v742_v56 = vmax.f32 %v692_v49, 0.0 }
 0x2d3   :  { %v694_v52 = vpop.f32.mrf.mxu0  ;;  %1404 = vmatmul.mubr.bf16.vlgmr.msra.gmra.mxu1 %v755_v47 }
 0x2d4   :  { %v695_v53 = vadd.f32 %v1184_v33, %v694_v52  ;;  %1459 = vmatpush3.bf16.msra.mxu1 %v1518_v26  ;;  %v745_v54 = vmax.f32 %v703_v50, 0.0  ;;  %v1525_v26 = vld [vmem:[#allocation11] sm:$0xff]  }
 0x2d5   :  { %v1381_v55 = vpop.f32.mrf.mxu0  ;;  %1452 = vmatprep.subr.bf16.mxu1 %v1519_v27  ;;  %1433 = vmatprep.subr.bf16.mxu0 %v1525_v26 }
 0x2d6   :  { %v743_v57 = vmax.f32 %v695_v53, 0.0  ;;  %v757_v61 = vpack.c.bf16 %v745_v54, %v744_v58  ;;  %v716_v1 = vadd.f32 %v1381_v55, %v1184_v33  ;;  %1434 = vmatpush3.bf16.msra.mxu0 %v1525_v26 }
 0x2d7   :  { %v707_v59 = vpop.f32.mrf.mxu0 }
 0x2d8   :  { %v756_v60 = vpack.c.bf16 %v743_v57, %v742_v56  ;;  %1460 = vmatpush3.bf16.msra.mxu1 %v1519_v27  ;;  %v708_v63 = vadd.f32 %v1184_v33, %v707_v59  ;;  %v748_v8 = vmax.f32 %v716_v1, 0.0 }
 0x2d9   :  { %v1382_v62 = vpop.f32.mrf.mxu0  ;;  %1453 = vmatprep.subr.bf16.mxu1 %v1520_v28 }
 0x2da   :  { %v719_v0 = vadd.f32 %v1382_v62, %v1184_v33  ;;  %1407 = vmatprep.mubr.bf16.mxu1 %v756_v60  ;;  %v746_v6 = vmax.f32 %v708_v63, 0.0 }
 0x2db   :  { %v710_v2 = vpop.f32.mrf.mxu0  ;;  %1408 = vmatmul.mubr.bf16.gmra.mxu1 %v757_v61 }
 0x2dc   :  { %v711_v3 = vadd.f32 %v1184_v33, %v710_v2  ;;  %1461 = vmatpush3.bf16.msra.mxu1 %v1520_v28  ;;  %v749_v4 = vmax.f32 %v719_v0, 0.0 }
 0x2dd   :  { %v1385_v5 = vpop.f32.mrf.mxu0  ;;  %1454 = vmatprep.subr.bf16.mxu1 %v1521_v29 }
 0x2de   :  { %v747_v7 = vmax.f32 %v711_v3, 0.0  ;;  %v759_v11 = vpack.c.bf16 %v749_v4, %v748_v8  ;;  %v732_v15 = vadd.f32 %v1385_v5, %v1184_v33 }
 0x2df   :  { %v723_v9 = vpop.f32.mrf.mxu0 }
 0x2e0   :  { %v758_v10 = vpack.c.bf16 %v747_v7, %v746_v6  ;;  %1462 = vmatpush3.bf16.msra.mxu1 %v1521_v29  ;;  %v724_v13 = vadd.f32 %v1184_v33, %v723_v9  ;;  %v752_v21 = vmax.f32 %v732_v15, 0.0  ;;  %v1193_v29 = vld [vmem:[%s1815_s8] ss:$0 sm:$0xff] }
 0x2e1   :  { %v1386_v12 = vpop.f32.mrf.mxu0  ;;  %1455 = vmatprep.subr.bf16.mxu1 %v1789_v30 }
 0x2e2   :  { %v735_v14 = vadd.f32 %v1386_v12, %v1184_v33  ;;  %1411 = vmatprep.mubr.bf16.mxu1 %v758_v10  ;;  %v750_v19 = vmax.f32 %v724_v13, 0.0 }
 0x2e3   :  { %v726_v16 = vpop.f32.mrf.mxu0  ;;  %1412 = vmatmul.mubr.bf16.gmra.mxu1 %v759_v11 }
 0x2e4   :  { %v727_v17 = vadd.f32 %v1184_v33, %v726_v16  ;;  %1463 = vmatpush3.bf16.msra.mxu1 %v1789_v30  ;;  %v753_v18 = vmax.f32 %v735_v14, 0.0 }
 0x2e5   :  { %1456 = vmatprep.subr.bf16.mxu1 %v1523_v24 }
 0x2e6   :  { %v751_v20 = vmax.f32 %v727_v17, 0.0  ;;  %v761_v23 = vpack.c.bf16 %v753_v18, %v752_v21 }
 0x2e8   :  { %v760_v22 = vpack.c.bf16 %v751_v20, %v750_v19  ;;  %1464 = vmatpush3.bf16.msra.mxu1 %v1523_v24  ;;  %v1202_v20 = vld [vmem:[%s1817_s10] ss:$0 sm:$0xff]  ;;  %s1684_s10 = smov [#allocation13]  }
 0x2e9   :  { %1457 = vmatprep.subr.bf16.mxu1 %v1524_v25  ;;  %s1143_s30 = sshll.u32 %s1684_s10, 4  ;;  %s1144_s30 = int_to_ptr.vmem [resolvable:$true] %s1143_s30 }
 0x2ea   :  { %1415 = vmatprep.mubr.bf16.mxu1 %v760_v22  ;;  %s1646_s12 = scalar_lea.vmem %s1144_s30, 2048  ;;  %p1651_p3 = scmp.lt.s32.totalorder %s1144_s30, %s1144_s30 }
 0x2eb   :  { %1416 = vmatmul.mubr.bf16.gmra.mxu1 %v761_v23  ;;  %p1647_p2 = scmp.ne.s32.totalorder %s1144_s30, %s1646_s12  ;;  %p1652_p4 = scmp.lt.s32.totalorder %s1646_s12, %s1646_s12 }
 0x2ec   :  { %1465 = vmatpush3.bf16.msra.mxu1 %v1524_v25 }
 0x2ed   :  { %1458 = vmatprep.subr.bf16.mxu1 %v1525_v26  ;;  %p1653_p5 = por %p1652_p4, %p1651_p3 }
 0x2ef   :  { %p1654_p6 = pnand %p1653_p5, %p1647_p2 }
 0x2f0   :  { %1466 = vmatpush3.bf16.msra.mxu1 %v1525_v26 }
 0x393   :  { %v1405_v27 = vpop.f32.mrf.mxu1 }
 0x394   :  { %v876_v33 = vadd.f32 %v1405_v27, %v1193_v29 }
 0x395   :  { %v867_v28 = vpop.f32.mrf.mxu1 }
 0x396   :  { %v868_v31 = vadd.f32 %v1193_v29, %v867_v28  ;;  %v932_v40 = vmax.f32 %v876_v33, 0.0 }
 0x397   :  { %v1406_v30 = vpop.f32.mrf.mxu1 }
 0x398   :  { %v879_v32 = vadd.f32 %v1406_v30, %v1193_v29  ;;  %v930_v38 = vmax.f32 %v868_v31, 0.0 }
 0x399   :  { %v870_v34 = vpop.f32.mrf.mxu1 }
 0x39a   :  { %v871_v35 = vadd.f32 %v1193_v29, %v870_v34  ;;  %v933_v36 = vmax.f32 %v879_v32, 0.0 }
 0x39b   :  { %v1409_v37 = vpop.f32.mrf.mxu1 }
 0x39c   :  { %v931_v39 = vmax.f32 %v871_v35, 0.0  ;;  %v947_v43 = vpack.c.bf16 %v933_v36, %v932_v40  ;;  %v892_v47 = vadd.f32 %v1409_v37, %v1193_v29 }
 0x39d   :  { %v883_v41 = vpop.f32.mrf.mxu1 }
 0x39e   :  { %v946_v42 = vpack.c.bf16 %v931_v39, %v930_v38  ;;  %v884_v45 = vadd.f32 %v1193_v29, %v883_v41  ;;  %v936_v54 = vmax.f32 %v892_v47, 0.0 }
 0x39f   :  { %v1410_v44 = vpop.f32.mrf.mxu1 }
 0x3a0   :  { %v895_v46 = vadd.f32 %v1410_v44, %v1193_v29  ;;  %1435 = vmatprep.mubr.bf16.mxu0 %v946_v42  ;;  %v934_v52 = vmax.f32 %v884_v45, 0.0 }
 0x3a1   :  { %v886_v48 = vpop.f32.mrf.mxu1  ;;  %1436 = vmatmul.mubr.bf16.vlgmr.msra.gmra.mxu0 %v947_v43 }
 0x3a2   :  { %v887_v49 = vadd.f32 %v1193_v29, %v886_v48  ;;  %v937_v50 = vmax.f32 %v895_v46, 0.0 }
 0x3a3   :  { %v1413_v51 = vpop.f32.mrf.mxu1 }
 0x3a4   :  { %v935_v53 = vmax.f32 %v887_v49, 0.0  ;;  %v949_v57 = vpack.c.bf16 %v937_v50, %v936_v54  ;;  %v908_v61 = vadd.f32 %v1413_v51, %v1193_v29 }
 0x3a5   :  { %v899_v55 = vpop.f32.mrf.mxu1 }
 0x3a6   :  { %v948_v56 = vpack.c.bf16 %v935_v53, %v934_v52  ;;  %v900_v59 = vadd.f32 %v1193_v29, %v899_v55  ;;  %v940_v4 = vmax.f32 %v908_v61, 0.0 }
 0x3a7   :  { %v1414_v58 = vpop.f32.mrf.mxu1 }
 0x3a8   :  { %v911_v60 = vadd.f32 %v1414_v58, %v1193_v29  ;;  %1439 = vmatprep.mubr.bf16.mxu0 %v948_v56  ;;  %v938_v2 = vmax.f32 %v900_v59, 0.0 }
 0x3a9   :  { %v902_v62 = vpop.f32.mrf.mxu1  ;;  %1440 = vmatmul.mubr.bf16.gmra.mxu0 %v949_v57 }
 0x3aa   :  { %v903_v63 = vadd.f32 %v1193_v29, %v902_v62  ;;  %v941_v0 = vmax.f32 %v911_v60, 0.0 }
 0x3ab   :  { %v1417_v1 = vpop.f32.mrf.mxu1 }
 0x3ac   :  { %v939_v3 = vmax.f32 %v903_v63, 0.0  ;;  %v951_v7 = vpack.c.bf16 %v941_v0, %v940_v4  ;;  %v924_v11 = vadd.f32 %v1417_v1, %v1193_v29 }
 0x3ad   :  { %v915_v5 = vpop.f32.mrf.mxu1 }
 0x3ae   :  { %v950_v6 = vpack.c.bf16 %v939_v3, %v938_v2  ;;  %v916_v9 = vadd.f32 %v1193_v29, %v915_v5  ;;  %v944_v17 = vmax.f32 %v924_v11, 0.0 }
 0x3af   :  { %v1418_v8 = vpop.f32.mrf.mxu1 }
 0x3b0   :  { %v927_v10 = vadd.f32 %v1418_v8, %v1193_v29  ;;  %1443 = vmatprep.mubr.bf16.mxu1 %v950_v6  ;;  %v942_v15 = vmax.f32 %v916_v9, 0.0 }
 0x3b1   :  { %v918_v12 = vpop.f32.mrf.mxu1  ;;  %1444 = vmatmul.mubr.bf16.vlgmr.msra.gmra.mxu1 %v951_v7 }
 0x3b2   :  { %v919_v13 = vadd.f32 %v1193_v29, %v918_v12  ;;  %v945_v14 = vmax.f32 %v927_v10, 0.0 }
 0x3b4   :  { %v943_v16 = vmax.f32 %v919_v13, 0.0  ;;  %v953_v19 = vpack.c.bf16 %v945_v14, %v944_v17 }
 0x3b6   :  { %v952_v18 = vpack.c.bf16 %v943_v16, %v942_v15 }
 0x3b8   :  { %1447 = vmatprep.mubr.bf16.mxu1 %v952_v18 }
 0x3b9   :  { %1448 = vmatmul.mubr.bf16.gmra.mxu1 %v953_v19 }
 0x461   :  { %v1437_v21 = vpop.f32.mrf.mxu0 }
 0x462   :  { %v1068_v22 = vadd.f32 %v1437_v21, %v1202_v20 }
 0x463   :  { %v1059_v23 = vpop.f32.mrf.mxu0 }
 0x464   :  { %1124 = vst [vmem:[#allocation13 + $0x10] sm:$0xff] %v1068_v22  ;;  %v1060_v24 = vadd.f32 %v1202_v20, %v1059_v23 }
 0x465   :  { %v1438_v25 = vpop.f32.mrf.mxu0 }
 0x466   :  { %1122 = vst [vmem:[#allocation13] sm:$0xff] %v1060_v24  ;;  %v1071_v26 = vadd.f32 %v1438_v25, %v1202_v20 }
 0x467   :  { %v1062_v27 = vpop.f32.mrf.mxu0 }
 0x468   :  { %1125 = vst [vmem:[#allocation13 + $0x18] sm:$0xff] %v1071_v26  ;;  %v1063_v28 = vadd.f32 %v1202_v20, %v1062_v27 }
 0x469   :  { %v1441_v29 = vpop.f32.mrf.mxu0 }
 0x46a   :  { %1123 = vst [vmem:[#allocation13 + $0x8] sm:$0xff] %v1063_v28  ;;  %v1084_v30 = vadd.f32 %v1441_v29, %v1202_v20 }
 0x46b   :  { %v1075_v31 = vpop.f32.mrf.mxu0 }
 0x46c   :  { %1128 = vst [vmem:[#allocation13 + $0x30] sm:$0xff] %v1084_v30  ;;  %v1076_v32 = vadd.f32 %v1202_v20, %v1075_v31 }
 0x46d   :  { %v1442_v33 = vpop.f32.mrf.mxu0 }
 0x46e   :  { %1126 = vst [vmem:[#allocation13 + $0x20] sm:$0xff] %v1076_v32  ;;  %v1087_v34 = vadd.f32 %v1442_v33, %v1202_v20 }
 0x46f   :  { %v1078_v35 = vpop.f32.mrf.mxu0 }
 0x470   :  { %1129 = vst [vmem:[#allocation13 + $0x38] sm:$0xff] %v1087_v34  ;;  %v1079_v36 = vadd.f32 %v1202_v20, %v1078_v35 }
 0x471   :  { %v1445_v37 = vpop.f32.mrf.mxu1 }
 0x472   :  { %1127 = vst [vmem:[#allocation13 + $0x28] sm:$0xff] %v1079_v36  ;;  %v1100_v38 = vadd.f32 %v1445_v37, %v1202_v20 }
 0x473   :  { %v1091_v39 = vpop.f32.mrf.mxu1 }
 0x474   :  { %1132 = vst [vmem:[#allocation13 + $0x50] sm:$0xff] %v1100_v38  ;;  %v1092_v40 = vadd.f32 %v1202_v20, %v1091_v39 }
 0x475   :  { %v1446_v41 = vpop.f32.mrf.mxu1 }
 0x476   :  { %1130 = vst [vmem:[#allocation13 + $0x40] sm:$0xff] %v1092_v40  ;;  %v1103_v42 = vadd.f32 %v1446_v41, %v1202_v20 }
 0x477   :  { %v1094_v43 = vpop.f32.mrf.mxu1 }
 0x478   :  { %1133 = vst [vmem:[#allocation13 + $0x58] sm:$0xff] %v1103_v42  ;;  %v1095_v44 = vadd.f32 %v1202_v20, %v1094_v43 }
 0x479   :  { %v1449_v45 = vpop.f32.mrf.mxu1 }
 0x47a   :  { %1131 = vst [vmem:[#allocation13 + $0x48] sm:$0xff] %v1095_v44  ;;  %v1116_v46 = vadd.f32 %v1449_v45, %v1202_v20 }
 0x47b   :  { %v1107_v47 = vpop.f32.mrf.mxu1 }
 0x47c   :  { %1136 = vst [vmem:[#allocation13 + $0x70] sm:$0xff] %v1116_v46  ;;  %v1108_v48 = vadd.f32 %v1202_v20, %v1107_v47 }
 0x47d   :  { %v1450_v49 = vpop.f32.mrf.mxu1 }
 0x47e   :  { %1134 = vst [vmem:[#allocation13 + $0x60] sm:$0xff] %v1108_v48  ;;  %v1119_v50 = vadd.f32 %v1450_v49, %v1202_v20 }
 0x47f   :  { %v1110_v51 = vpop.f32.mrf.mxu1 }
 0x480   :  { %1137 = vst [vmem:[#allocation13 + $0x78] sm:$0xff] %v1119_v50  ;;  %v1111_v52 = vadd.f32 %v1202_v20, %v1110_v51 }
 0x482   :  { %1135 = vst [vmem:[#allocation13 + $0x68] sm:$0xff] %v1111_v52 }
 0x483   :  { %1657 = shalt.err (!%p1654_p6)
}
 0x484   :  { %s1685_s13 = smov 128   ;;  %s1686_s1 = smov 8  }
 0x485   :  { %1149 = dma.vmem_to_hbm [thread:$0]  %s1144_s30, 2048, %s1818_s11, [#allocation4], %s1685_s13, %s1685_s13, %s1686_s1  }
 0x486   :  { %1674 = dma.done.wait [#allocation4], 2048  }
 0x487   :  { %1675 = vsyncadd [#allocation4], 4294965248 }
 0x488   :  { %1153 = vsyncpa [#allocation3], 1 }
 0x489   :  { %1154 = vsyncpa [#allocation6], 1 }
 0x48a   :  { %1155 = vsyncpa [#allocation9], 1 }
 0x48b   :  { %1156 = vsyncpa [#allocation12], 1 }
 0x48c   :  { %1157 = vsyncpa [#allocation4], 1 }

</bundles_post_ra>
